<compile_context>
chip_gen: v7x
topology: tpu7x:2x2x1
jax: 0.10.0
libtpu: 0.0.40
codegen_flags: <defaults>
</compile_context>

<pallas_src>
import functools
import math

import jax
import jax.numpy as jnp
from jax.experimental import pallas as pl
from jax.experimental.pallas import tpu as pltpu


# ----------------------------------------------------------------------------
# Shape / VMEM helpers
# ----------------------------------------------------------------------------
def _round_up(x, m):
    return (x + m - 1) // m * m


def _tile_and_pad(dim, target):
    """(tile, padded_dim): full-dim block for small dims, else `target` tiles."""
    if dim <= target:
        return dim, dim
    return target, _round_up(dim, target)


def _vmem_limit(block_bytes):
    """Scoped-VMEM request: double-buffered blocks + slack, capped v7x-safe."""
    est = 2 * int(block_bytes) + (4 << 20)
    # TODO(synk): on v5e/v6e (128 MiB physical) the cap could be raised.
    return int(min(max(est, 32 << 20), 64 << 20))


# ----------------------------------------------------------------------------
# 1. Tiled matmul kernel:  y = x @ w_t    (w_t = W.T, i.e. F.linear no-bias)
# ----------------------------------------------------------------------------
def _matmul_kernel(x_ref, w_ref, o_ref, acc_ref):
    @pl.when(pl.program_id(2) == 0)
    def _():
        acc_ref[...] = jnp.zeros_like(acc_ref)

    acc_ref[...] += jnp.dot(x_ref[...], w_ref[...],
                            preferred_element_type=jnp.float32)

    @pl.when(pl.program_id(2) == pl.num_programs(2) - 1)
    def _():
        o_ref[...] = acc_ref[...].astype(o_ref.dtype)


def pallas_matmul(x, w_t, *, out_dtype=jnp.float32, tm=256, tn=256, tk=512):
    """x:(M,K) @ w_t:(K,N) -> (M,N).  Ragged dims handled by zero-pad + cdiv grid."""
    # TODO(synk): sweep tm/tn up to 512 on v5e/v6e (128 MiB VMEM); defaults are
    # v7x-safe.
    M, K = x.shape
    K2, N = w_t.shape
    assert K == K2
    tm, Mp = _tile_and_pad(M, tm)
    tn, Np = _tile_and_pad(N, tn)
    tk, Kp = _tile_and_pad(K, tk)
    if (Mp, Kp) != (M, K):
        x = jnp.pad(x, ((0, Mp - M), (0, Kp - K)))
    if (Kp, Np) != (K, N):
        w_t = jnp.pad(w_t, ((0, Kp - K), (0, Np - N)))
    bs = x.dtype.itemsize
    limit = _vmem_limit(tm * tk * bs + tk * tn * bs + 2 * tm * tn * 4)
    out = pl.pallas_call(
        _matmul_kernel,
        out_shape=jax.ShapeDtypeStruct((Mp, Np), out_dtype),
        grid_spec=pltpu.PrefetchScalarGridSpec(
            num_scalar_prefetch=0,
            grid=(Mp // tm, Np // tn, Kp // tk),
            in_specs=[pl.BlockSpec((tm, tk), lambda i, j, k: (i, k)),
                      pl.BlockSpec((tk, tn), lambda i, j, k: (k, j))],
            out_specs=pl.BlockSpec((tm, tn), lambda i, j, k: (i, j)),
            scratch_shapes=[pltpu.VMEM((tm, tn), jnp.float32)]),
        compiler_params=pltpu.CompilerParams(
            dimension_semantics=("parallel", "parallel", "arbitrary"),
            vmem_limit_bytes=limit),
        cost_estimate=pl.CostEstimate(
            flops=2 * M * N * K, transcendentals=0,
            bytes_accessed=bs * (M * K + K * N)
            + jnp.dtype(out_dtype).itemsize * M * N),
    )(x, w_t)
    if (Mp, Np) != (M, N):
        out = out[:M, :N]
    return out


# ----------------------------------------------------------------------------
# 2. Attention kernel (one (batch, query-tile) per grid step)
# ----------------------------------------------------------------------------
def _attn_kernel(q_ref, k_ref, v_ref, know_ref, adj_ref, o_ref, acc_ref, *,
                 nhead, head_dim, scaling):
    adj = adj_ref[0]                                         # (tq, Sp)
    for h in range(nhead):                                   # static, unrolled
        lo = h * head_dim
        q_h = q_ref[0, :, lo:lo + head_dim]                  # (tq, Dh)
        k_h = k_ref[0, :, lo:lo + head_dim]                  # (Sp, Dh)
        v_h = v_ref[0, :, lo:lo + head_dim]                  # (Sp, Dh)
        kn_h = know_ref[0, :, :, lo:lo + head_dim]           # (tq, Sp, Dh)

        # scores[i,j] = scaling * sum_d q[i,d] * (k[j,d] + know[i,j,d])
        s = jax.lax.dot_general(q_h, k_h, (((1,), (1,)), ((), ())),   # MXU
                                preferred_element_type=jnp.float32)
        # knowledge bias: VPU multiply + reduce (no 1-row MXU matmuls)
        s = s + jnp.sum((q_h[:, None, :] * kn_h).astype(jnp.float32), axis=-1)
        s = s * scaling
        s = jnp.where(adj > 0, s, jnp.float32(-1e30))

        # softmax over keys (denominator reciprocal on the EUP)
        m = jnp.max(s, axis=-1, keepdims=True)
        e = jnp.exp(s - m)
        attn = e * pl.reciprocal(jnp.sum(e, axis=-1, keepdims=True), approx=True)

        # out[i,d] = sum_j attn[i,j] * (v[j,d] + know[i,j,d])
        out_h = jnp.dot(attn.astype(v_h.dtype), v_h,                  # MXU
                        preferred_element_type=jnp.float32)
        out_h = out_h + jnp.sum(attn[:, :, None] * kn_h.astype(jnp.float32),
                                axis=1)
        acc_ref[:, lo:lo + head_dim] = out_h                 # head slot in scratch

    # single full-width, lane-dense store (heads interleaved like the module)
    o_ref[0] = acc_ref[...].astype(o_ref.dtype)


def attention(qkvr, know_g, adj, *, B, S, nhead, head_dim):
    """qkvr:(B*S,4E) fused projection, know_g:(B,S,S,E) projected+gathered know."""
    E = nhead * head_dim
    cdt = qkvr.dtype
    tq, Sp = _tile_and_pad(S, 128)        # query tile; keys stay fully resident
    qkv3 = qkvr.reshape(B, S, 4 * E)
    if Sp != S:
        # Padded keys are masked out via adj == 0; padded query rows are sliced.
        qkv3 = jnp.pad(qkv3, ((0, 0), (0, Sp - S), (0, 0)))
        know_g = jnp.pad(know_g, ((0, 0), (0, Sp - S), (0, Sp - S), (0, 0)))
        adj = jnp.pad(adj, ((0, 0), (0, Sp - S), (0, Sp - S)))

    if E % 128 == 0:
        # zero-copy: column-block index maps into the fused projection output
        q_in, k_in, v_in = qkv3, qkv3, qkv3
        q_spec = pl.BlockSpec((1, tq, E), lambda b, q: (b, q, 0))
        k_spec = pl.BlockSpec((1, Sp, E), lambda b, q: (b, 0, 1))
        v_spec = pl.BlockSpec((1, Sp, E), lambda b, q: (b, 0, 2))
    else:
        # TODO(synk): column-block maps need a 128-multiple lane width; for the
        # small demo E we slice narrow q / k / v slabs instead (still no 4E DMA).
        q_in = qkv3[..., :E]
        k_in = qkv3[..., E:2 * E]
        v_in = qkv3[..., 2 * E:3 * E]
        q_spec = pl.BlockSpec((1, tq, E), lambda b, q: (b, q, 0))
        k_spec = pl.BlockSpec((1, Sp, E), lambda b, q: (b, 0, 0))
        v_spec = pl.BlockSpec((1, Sp, E), lambda b, q: (b, 0, 0))

    dsz = jnp.dtype(cdt).itemsize
    limit = _vmem_limit(tq * E * dsz + 2 * Sp * E * dsz + tq * Sp * E * dsz
                        + tq * Sp * adj.dtype.itemsize + 2 * tq * E * 4)
    kern = functools.partial(_attn_kernel, nhead=nhead, head_dim=head_dim,
                             scaling=float(head_dim) ** -0.5)
    out = pl.pallas_call(
        kern,
        out_shape=jax.ShapeDtypeStruct((B, Sp, E), jnp.float32),
        grid_spec=pltpu.PrefetchScalarGridSpec(
            num_scalar_prefetch=0,
            grid=(B, Sp // tq),
            in_specs=[
                q_spec,                                            # q tile
                k_spec,                                            # keys (resident)
                v_spec,                                            # values (resident)
                pl.BlockSpec((1, tq, Sp, E), lambda b, q: (b, q, 0, 0)),  # know
                pl.BlockSpec((1, tq, Sp), lambda b, q: (b, q, 0)),        # adj
            ],
            out_specs=pl.BlockSpec((1, tq, E), lambda b, q: (b, q, 0)),
            scratch_shapes=[pltpu.VMEM((tq, E), jnp.float32)]),
        compiler_params=pltpu.CompilerParams(
            # q-tile axis is "arbitrary" so the resident K/V blocks are not
            # re-fetched under the v7x megacore split.
            dimension_semantics=("parallel", "arbitrary"),
            vmem_limit_bytes=limit),
    )(q_in, k_in, v_in, know_g, adj)
    return out[:, :S, :] if Sp != S else out


# ----------------------------------------------------------------------------
# 3. Fused beta-gate + MLP + residual + LayerNorm kernel
# ----------------------------------------------------------------------------
def _gate_mlp_kernel(attn_ref, r_ref, wba_ref, wbr_ref, wbd_ref,
                     w1t_ref, b1_ref, w2t_ref, b2_ref, g_ref, bln_ref, o_ref):
    a = attn_ref[...].astype(jnp.float32)                    # (tm, E)
    r = r_ref[...].astype(jnp.float32)                       # (tm, E)
    logit = (jnp.sum(a * wba_ref[...], axis=-1, keepdims=True)
             + jnp.sum(r * wbr_ref[...], axis=-1, keepdims=True)
             + jnp.sum((a - r) * wbd_ref[...], axis=-1, keepdims=True))
    gate = jax.nn.sigmoid(logit)
    x2 = gate * r + (1.0 - gate) * a
    # MLP (dropout = identity at inference); MXU fed compute-dtype operands
    w1t = w1t_ref[...]
    h1 = jnp.maximum(jnp.dot(x2.astype(w1t.dtype), w1t,
                             preferred_element_type=jnp.float32)
                     + b1_ref[...], 0.0)
    w2t = w2t_ref[...]
    h2 = jnp.dot(h1.astype(w2t.dtype), w2t,
                 preferred_element_type=jnp.float32) + b2_ref[...]
    z = h2 + x2
    # LayerNorm (eps = 1e-5)
    mu = jnp.mean(z, axis=-1, keepdims=True)
    var = jnp.mean(jnp.square(z - mu), axis=-1, keepdims=True)
    o_ref[...] = ((z - mu) * jax.lax.rsqrt(var + 1e-5)
                  * g_ref[...] + bln_ref[...]).astype(o_ref.dtype)


def gate_mlp_ln(attn2d, qkvr, lp, *, E, tm=128):
    """attn2d:(M,E) f32, qkvr:(M,4E) fused projection ([q|k|v|skip] columns)."""
    # tm=128 keeps the (tm, Fd) f32 h1 intermediate small (v7x-friendly).
    M = attn2d.shape[0]
    Fd = lp["w1_t"].shape[1]
    cdt = lp["w1_t"].dtype
    tm, Mp = _tile_and_pad(M, tm)

    if E % 128 == 0:
        r_in = qkvr                      # zero-copy: column block 3 = skip_lin(x)
        r_spec = pl.BlockSpec((tm, E), lambda i: (i, 3))
    else:
        # TODO(synk): column-block map needs a 128-multiple lane width.
        r_in = qkvr[:, 3 * E:]
        r_spec = pl.BlockSpec((tm, E), lambda i: (i, 0))
    if Mp != M:
        attn2d = jnp.pad(attn2d, ((0, Mp - M), (0, 0)))
        r_in = jnp.pad(r_in, ((0, Mp - M), (0, 0)))

    row = lambda i: (i, 0)
    const = lambda i: (0, 0)
    dsz = jnp.dtype(cdt).itemsize
    limit = _vmem_limit(tm * E * (4 + dsz) + 2 * E * Fd * dsz
                        + (Fd + 8 * E) * 4 + tm * E * 4)
    out = pl.pallas_call(
        _gate_mlp_kernel,
        out_shape=jax.ShapeDtypeStruct((Mp, E), jnp.float32),
        grid_spec=pltpu.PrefetchScalarGridSpec(
            num_scalar_prefetch=0,
            grid=(Mp // tm,),
            in_specs=[pl.BlockSpec((tm, E), row),     # attn_sum
                      r_spec,                         # r (skip_lin(x))
                      pl.BlockSpec((1, E), const),    # beta weight slices
                      pl.BlockSpec((1, E), const),
                      pl.BlockSpec((1, E), const),
                      pl.BlockSpec((E, Fd), const),   # W1.T
                      pl.BlockSpec((1, Fd), const),   # b1
                      pl.BlockSpec((Fd, E), const),   # W2.T
                      pl.BlockSpec((1, E), const),    # b2
                      pl.BlockSpec((1, E), const),    # ln gamma
                      pl.BlockSpec((1, E), const)],   # ln beta
            out_specs=pl.BlockSpec((tm, E), row)),
        compiler_params=pltpu.CompilerParams(
            dimension_semantics=("parallel",), vmem_limit_bytes=limit),
    )(attn2d, r_in, lp["wb_a"], lp["wb_r"], lp["wb_d"],
      lp["w1_t"], lp["b1"], lp["w2_t"], lp["b2"], lp["ln_g"], lp["ln_b"])
    return out[:M] if Mp != M else out


# ----------------------------------------------------------------------------
# Parameter preparation (done ONCE, not per forward): fuse / transpose / cast.
# ----------------------------------------------------------------------------
def prepare_params(params, compute_dtype):
    layers = []
    for lp in params["layers"]:
        E = lp["q"].shape[0]
        layers.append({
            "qkvr_t": jnp.concatenate([lp["q"], lp["k"], lp["v"], lp["skip"]],
                                      axis=0).T.astype(compute_dtype),
            "know_t": lp["know"].T.astype(compute_dtype),
            "wb_a": lp["beta"][:, :E].astype(jnp.float32),
            "wb_r": lp["beta"][:, E:2 * E].astype(jnp.float32),
            "wb_d": lp["beta"][:, 2 * E:].astype(jnp.float32),
            "w1_t": lp["w1"].T.astype(compute_dtype),
            "b1": lp["b1"].reshape(1, -1).astype(jnp.float32),
            "w2_t": lp["w2"].T.astype(compute_dtype),
            "b2": lp["b2"].reshape(1, -1).astype(jnp.float32),
            "ln_g": lp["ln_g"].reshape(1, -1).astype(jnp.float32),
            "ln_b": lp["ln_b"].reshape(1, -1).astype(jnp.float32),
        })
    return {"layers": layers}


# ----------------------------------------------------------------------------
# Encoder forward (wires the kernels together)
# ----------------------------------------------------------------------------
def graph_transformer_layer(lp, h, adj, knowledge_c, know_idx, *,
                            nhead, compute_dtype):
    B, S, E = h.shape
    Dh = E // nhead
    x2d = h.reshape(B * S, E).astype(compute_dtype)
    # fused q/k/v/skip projection: x is read from HBM once
    qkvr = pallas_matmul(x2d, lp["qkvr_t"], out_dtype=compute_dtype)   # (B*S, 4E)
    # project-then-gather: project the small (N_KNOW, E) table, then gather the
    # projected rows (gather of a linear map == linear map of the gather).
    know_tab = pallas_matmul(knowledge_c, lp["know_t"],
                             out_dtype=compute_dtype)                  # (N_KNOW, E)
    # TODO(synk): in-kernel gather of know_tab (resident in VMEM) would also
    # remove this (B,S,S,E) HBM materialization.
    know_g = jnp.take(know_tab, know_idx, axis=0).reshape(B, S, S, E)
    attn = attention(qkvr, know_g, adj, B=B, S=S, nhead=nhead, head_dim=Dh)
    out = gate_mlp_ln(attn.reshape(B * S, E), qkvr, lp, E=E)
    return out.reshape(B, S, E)


def graph_transformer_encoder(prepared, x, adj, knowledge, know_adj, *,
                              nhead, compute_dtype=jnp.bfloat16):
    B, S, E = x.shape
    know_idx = know_adj.reshape(-1)
    knowledge_c = knowledge.astype(compute_dtype)
    h = x
    for lp in prepared["layers"]:
        h = graph_transformer_layer(lp, h, adj, knowledge_c, know_idx,
                                    nhead=nhead, compute_dtype=compute_dtype)
    return h


# ----------------------------------------------------------------------------
# Pure-JAX reference mirroring the PyTorch forward (for the correctness check)
# ----------------------------------------------------------------------------
def reference(params, x, adj, knowledge, know_adj, *, nhead):
    B, S, E = x.shape
    Dh = E // nhead
    BH = B * nhead
    scaling = float(Dh) ** -0.5
    adj_bh = jnp.broadcast_to(adj[:, None], (B, nhead, S, S)).reshape(BH, S, S)
    know = jnp.take(knowledge, know_adj.reshape(-1), axis=0).reshape(B, S * S, E)
    x1 = jnp.swapaxes(x, 0, 1)                                     # (S, B, E)
    for lp in params["layers"]:
        kp = jnp.dot(know, lp["know"].T).reshape(B, S * S, nhead, Dh)
        kp = jnp.swapaxes(kp, 0, 1).reshape(S * S, BH, Dh)
        kp = jnp.swapaxes(kp, 0, 1).reshape(BH, S, S, Dh)
        q = jnp.swapaxes(jnp.dot(x1, lp["q"].T).reshape(S, BH, Dh), 0, 1)
        k = jnp.swapaxes(jnp.dot(x1, lp["k"].T).reshape(S, BH, Dh), 0, 1)
        v = jnp.swapaxes(jnp.dot(x1, lp["v"].T).reshape(S, BH, Dh), 0, 1)
        aw = (q[:, :, None, :] * (k[:, None, :, :] + kp)).sum(-1) * scaling
        aw = jnp.where(adj_bh > 0, aw, -1e30)        # assumed mask_logic
        aw = jax.nn.softmax(aw, axis=2)
        attn_sum = ((v[:, None, :, :] + kp) * aw[..., None]).sum(2)
        attn_sum = jnp.swapaxes(attn_sum, 0, 1).reshape(S, B, E)
        r = jnp.dot(x1, lp["skip"].T)
        gate = jax.nn.sigmoid(jnp.dot(
            jnp.concatenate([attn_sum, r, attn_sum - r], axis=-1),
            lp["beta"].T))
        x2 = gate * r + (1.0 - gate) * attn_sum
        h1 = jax.nn.relu(jnp.dot(x2, lp["w1"].T) + lp["b1"])
        h2 = jnp.dot(h1, lp["w2"].T) + lp["b2"]
        z = h2 + x2
        mu = z.mean(-1, keepdims=True)
        var = ((z - mu) ** 2).mean(-1, keepdims=True)
        x1 = (z - mu) / jnp.sqrt(var + 1e-5) * lp["ln_g"] + lp["ln_b"]
    return jnp.swapaxes(x1, 0, 1)


# ----------------------------------------------------------------------------
# Deterministic parameter init (xavier_uniform, like _reset_parameter)
# ----------------------------------------------------------------------------
def xavier_uniform(key, shape):
    fan_out, fan_in = shape
    bound = math.sqrt(6.0 / (fan_in + fan_out))
    return jax.random.uniform(key, shape, jnp.float32, -bound, bound)


def init_layer(key, emb, ff):
    ks = jax.random.split(key, 10)
    return {
        "q":    xavier_uniform(ks[0], (emb, emb)),
        "k":    xavier_uniform(ks[1], (emb, emb)),
        "v":    xavier_uniform(ks[2], (emb, emb)),
        "know": xavier_uniform(ks[3], (emb, emb)),
        "skip": xavier_uniform(ks[4], (emb, emb)),
        "beta": xavier_uniform(ks[5], (1, 3 * emb)),
        "w1":   xavier_uniform(ks[6], (ff, emb)),
        "b1":   jax.random.uniform(ks[7], (ff,), jnp.float32, -0.1, 0.1),
        "w2":   xavier_uniform(ks[8], (emb, ff)),
        "b2":   jax.random.uniform(ks[9], (emb,), jnp.float32, -0.1, 0.1),
        "ln_g": jnp.ones((emb,), jnp.float32),
        "ln_b": jnp.zeros((emb,), jnp.float32),
    }


if __name__ == "__main__":
    jax.config.update("jax_default_matmul_precision", "highest")

    NUM_LAYERS, NHEAD, EMB, FF = 2, 4, 32, 64
    B, S, N_KNOW = 2, 8, 10

    root = jax.random.PRNGKey(0)
    k_layers, kx, kadj, kknow, kidx = jax.random.split(root, 5)
    params = {"layers": [init_layer(k, EMB, FF)
                         for k in jax.random.split(k_layers, NUM_LAYERS)]}

    x = jax.random.normal(kx, (B, S, EMB), jnp.float32)
    adj = (jax.random.uniform(kadj, (B, S, S)) > 0.5).astype(jnp.float32)
    adj = jnp.maximum(adj, jnp.eye(S, dtype=jnp.float32)[None])  # keep diag on
    knowledge = jax.random.normal(kknow, (N_KNOW, EMB), jnp.float32)
    know_adj = jax.random.randint(kidx, (B, S, S), 0, N_KNOW, jnp.int32)

    ref = reference(params, x, adj, knowledge, know_adj, nhead=NHEAD)

    # f32 compute path: tight check (small slack for the EUP approx reciprocal
    # used in the softmax normalization).
    prep32 = prepare_params(params, jnp.float32)
    out32 = graph_transformer_encoder(prep32, x, adj, knowledge, know_adj,
                                      nhead=NHEAD, compute_dtype=jnp.float32)
    out32 = jax.block_until_ready(out32)
    assert out32.shape == (B, S, EMB), out32.shape
    err32 = float(jnp.max(jnp.abs(out32 - ref)))
    assert jnp.allclose(out32, ref, atol=5e-3, rtol=5e-3), err32

    # bf16 compute path (native MXU rate, halved HBM/VMEM traffic): loose check.
    prep16 = prepare_params(params, jnp.bfloat16)
    out16 = graph_transformer_encoder(prep16, x, adj, knowledge, know_adj,
                                      nhead=NHEAD, compute_dtype=jnp.bfloat16)
    out16 = jax.block_until_ready(out16)
    assert out16.shape == (B, S, EMB), out16.shape
    err16 = float(jnp.max(jnp.abs(out16 - ref)))
    assert jnp.allclose(out16, ref, atol=5e-2, rtol=5e-2), err16

    print("KERNEL_OK")
</pallas_src>

<mosaic_0001>
module attributes {stable_mosaic.version = 11 : i64} {
  func.func @_matmul_kernel(%arg0: i32, %arg1: i32, %arg2: i32, %arg3: memref<16x32xf32, #tpu.memory_space<vmem>>, %arg4: memref<32x128xf32, #tpu.memory_space<vmem>>, %arg5: memref<16x128xf32, #tpu.memory_space<vmem>>, %arg6: memref<16x128xf32, #tpu.memory_space<vmem>>) attributes {dimension_semantics = [#tpu.dimension_semantics<parallel>, #tpu.dimension_semantics<parallel>, #tpu.dimension_semantics<arbitrary>], iteration_bounds = array<i64: 1, 1, 1>, scalar_prefetch = 0 : i64, scratch_operands = 1 : i64, tpu.core_type = #tpu.core_type<tc>, window_params = [{transform_indices = @transform_0, window_bounds = array<i64: 16, 32>}, {transform_indices = @transform_1, window_bounds = array<i64: 32, 128>}, {transform_indices = @transform_2, window_bounds = array<i64: 16, 128>}]} {
    %c0_i32 = arith.constant 0 : i32
    %0 = arith.cmpi eq, %arg2, %c0_i32 : i32
    %1 = arith.extui %0 : i1 to i32
    %c0_i32_0 = arith.constant 0 : i32
    %2 = arith.cmpi ne, %1, %c0_i32_0 : i32
    scf.if %2 {
      %cst_10 = arith.constant 0.000000e+00 : f32
      %12 = vector.broadcast %cst_10 : f32 to vector<16x128xf32>
      %c0_11 = arith.constant 0 : index
      %c0_12 = arith.constant 0 : index
      %13 = vector.load %arg6[%c0_11, %c0_12] : memref<16x128xf32, #tpu.memory_space<vmem>>, vector<16x128xf32>
      tpu.vector_store %arg6[%c0_11, %c0_12], %12 {strides = array<i32>} : memref<16x128xf32, #tpu.memory_space<vmem>>, vector<16x128xf32>,
    } else {
    }
    %c0 = arith.constant 0 : index
    %c0_1 = arith.constant 0 : index
    %3 = vector.load %arg6[%c0, %c0_1] : memref<16x128xf32, #tpu.memory_space<vmem>>, vector<16x128xf32>
    %c0_2 = arith.constant 0 : index
    %c0_3 = arith.constant 0 : index
    %4 = vector.load %arg3[%c0_2, %c0_3] : memref<16x32xf32, #tpu.memory_space<vmem>>, vector<16x32xf32>
    %c0_4 = arith.constant 0 : index
    %c0_5 = arith.constant 0 : index
    %5 = vector.load %arg4[%c0_4, %c0_5] : memref<32x128xf32, #tpu.memory_space<vmem>>, vector<32x128xf32>
    %cst = arith.constant dense<0.000000e+00> : vector<16x128xf32>
    %6 = tpu.matmul %4, %5, %cst {dimension_numbers = #tpu.dot_dimension_numbers<[1], [0], [0], [1], [0, 0, 1, 1], [], []>, precision = #tpu.contract_precision<fp32>} : vector<16x32xf32>, vector<32x128xf32>, vector<16x128xf32> -> vector<16x128xf32>
    %7 = arith.addf %3, %6 : vector<16x128xf32>
    %c0_6 = arith.constant 0 : index
    %c0_7 = arith.constant 0 : index
    %8 = vector.load %arg6[%c0_6, %c0_7] : memref<16x128xf32, #tpu.memory_space<vmem>>, vector<16x128xf32>
    tpu.vector_store %arg6[%c0_6, %c0_7], %7 {strides = array<i32>} : memref<16x128xf32, #tpu.memory_space<vmem>>, vector<16x128xf32>,
    %c0_i32_8 = arith.constant 0 : i32
    %9 = arith.cmpi eq, %arg2, %c0_i32_8 : i32
    %10 = arith.extui %9 : i1 to i32
    %c0_i32_9 = arith.constant 0 : i32
    %11 = arith.cmpi ne, %10, %c0_i32_9 : i32
    scf.if %11 {
      %c0_10 = arith.constant 0 : index
      %c0_11 = arith.constant 0 : index
      %12 = vector.load %arg6[%c0_10, %c0_11] : memref<16x128xf32, #tpu.memory_space<vmem>>, vector<16x128xf32>
      %c0_12 = arith.constant 0 : index
      %c0_13 = arith.constant 0 : index
      %13 = vector.load %arg5[%c0_12, %c0_13] : memref<16x128xf32, #tpu.memory_space<vmem>>, vector<16x128xf32>
      tpu.vector_store %arg5[%c0_12, %c0_13], %12 {strides = array<i32>} : memref<16x128xf32, #tpu.memory_space<vmem>>, vector<16x128xf32>,
    } else {
    }
    return
  }
  func.func @transform_0(%arg0: i32, %arg1: i32, %arg2: i32) -> (i32, i32) {
    %c0_i32 = arith.constant 0 : i32
    return %arg0, %arg2 : i32, i32
  }
  func.func @transform_1(%arg0: i32, %arg1: i32, %arg2: i32) -> (i32, i32) {
    %c0_i32 = arith.constant 0 : i32
    return %arg2, %arg1 : i32, i32
  }
  func.func @transform_2(%arg0: i32, %arg1: i32, %arg2: i32) -> (i32, i32) {
    %c0_i32 = arith.constant 0 : i32
    return %arg0, %arg1 : i32, i32
  }
}

</mosaic_0001>

<bundles_post_ra>
// kernel: tpu_custom_call.1
= control target key start
LH: loop header
LB: loop body
LE: loop exit
PB: predicated region body
PF: predicated region fallthrough
CT: control target
= control target key end

     0   :  { %7 = vsyncpa [#allocation4], 0  ;;  %s932_s0 = inlined_call_operand.hbm [shape: f32[16,32], index: 0, kind: input, shape index: {}]   ;;  %s933_s1 = inlined_call_operand.hbm [shape: f32[32,128], index: 1, kind: input, shape index: {}]   ;;  %s934_s2 = inlined_call_operand.hbm [shape: f32[16,128], index: 2, kind: output, shape index: {}]  }
   0x1   :  { %8 = vsyncpa [#allocation7], 0 }
   0x2   :  { %9 = vsyncpa [#allocation5], 0  ;;  %s855_s9 = smov [#allocation3]   ;;  %s783_s13 = scalar_lea.hbm %s932_s0, 256 }
   0x3   :  { %s15_s10 = sshll.u32 %s855_s9, 4  ;;  %p784_p0 = scmp.ne.s32.totalorder %s932_s0, %s783_s13  ;;  %s16_s10 = int_to_ptr.vmem [resolvable:$true] %s15_s10 }
   0x4   :  { %p787_p1 = scmp.lt.u32.totalorder %s783_s13, %s932_s0 }
   0x6   :  { %p789_p2 = pnand %p787_p1, %p784_p0 }
   0x8   :  { %792 = shalt.err (!%p789_p2)
}
   0x9   :  { %s793_s18 = scalar_lea.vmem %s16_s10, 256  ;;  %p798_p4 = scmp.lt.s32.totalorder %s16_s10, %s16_s10 }
   0xa   :  { %p794_p3 = scmp.ne.s32.totalorder %s16_s10, %s793_s18  ;;  %p799_p5 = scmp.lt.s32.totalorder %s793_s18, %s793_s18 }
   0xc   :  { %p800_p6 = por %p799_p5, %p798_p4 }
   0xe   :  { %p801_p7 = pnand %p800_p6, %p794_p3 }
  0x10   :  { %804 = shalt.err (!%p801_p7)
}
  0x11   :  { %s856_s19 = smov 128   ;;  %s857_s20 = smov 8  }
  0x12   :  { %21 = dma.hbm_to_vmem [thread:$0]  %s932_s0, 256, %s16_s10, [#allocation4], %s856_s19, %s856_s19, %s857_s20  }
  0x13   :  { %s858_s23 = smov [#allocation6]   ;;  %s805_s27 = scalar_lea.hbm %s933_s1, 512 }
  0x14   :  { %s27_s24 = sshll.u32 %s858_s23, 4  ;;  %p806_p8 = scmp.ne.s32.totalorder %s933_s1, %s805_s27  ;;  %s28_s24 = int_to_ptr.vmem [resolvable:$true] %s27_s24 }
  0x15   :  { %p809_p9 = scmp.lt.u32.totalorder %s805_s27, %s933_s1 }
  0x17   :  { %p811_p10 = pnand %p809_p9, %p806_p8 }
  0x19   :  { %814 = shalt.err (!%p811_p10)
}
  0x1a   :  { %s815_s4 = scalar_lea.vmem %s28_s24, 512  ;;  %p820_p12 = scmp.lt.s32.totalorder %s28_s24, %s28_s24 }
  0x1b   :  { %p816_p11 = scmp.ne.s32.totalorder %s28_s24, %s815_s4  ;;  %p821_p13 = scmp.lt.s32.totalorder %s815_s4, %s815_s4 }
  0x1d   :  { %p822_p0 = por %p821_p13, %p820_p12 }
  0x1f   :  { %p823_p1 = pnand %p822_p0, %p816_p11 }
  0x21   :  { %826 = shalt.err (!%p823_p1)
}
  0x22   :  { %33 = dma.hbm_to_vmem [thread:$0]  %s933_s1, 512, %s28_s24, [#allocation7], %s856_s19, %s856_s19, %s857_s20  }
  0x23   :  { %849 = dma.done.wait [#allocation4], 256  }
  0x24   :  { %850 = vsyncadd [#allocation4], 4294967040 }
  0x25   :  { %851 = dma.done.wait [#allocation7], 512  }
  0x26   :  { %852 = vsyncadd [#allocation7], 4294966784  ;;  %vm54_vm0 = vcmask 261120   ;;  %v50_v0 = vld [vmem:[#allocation6] sm:$0xff]  ;;  %v51_v1 = vld [vmem:[#allocation6 + $0x8] sm:$0xff]  ;;  %s859_s1 = smov [#allocation8]  }
  0x27   :  { %v52_v2 = vld [vmem:[#allocation6 + $0x10] sm:$0xff]  ;;  %v62_v3 = vand.u32 4294901760, %v50_v0  ;;  %v65_v4 = vand.u32 4294901760, %v51_v1  ;;  %v53_v5 = vld [vmem:[#allocation6 + $0x18] sm:$0xff]  ;;  %s605_s6 = sshll.u32 %s859_s1, 4  ;;  %s606_s6 = int_to_ptr.vmem [resolvable:$true] %s605_s6 }
  0x28   :  { %v68_v6 = vand.u32 4294901760, %v52_v2  ;;  %v48_v7 = vld [vmem:[#allocation3] sm:$0xff]  ;;  %v49_v8 = vld [vmem:[#allocation3 + $0x8] sm:$0xff]  ;;  %v71_v9 = vand.u32 4294901760, %v53_v5  ;;  %s827_s7 = scalar_lea.vmem %s606_s6, 256  ;;  %p832_p3 = scmp.lt.s32.totalorder %s606_s6, %s606_s6 }
  0x29   :  { %v56_v10 = vsel %vm54_vm0, %v48_v7, 0  ;;  %v59_v11 = vsel %vm54_vm0, %v49_v8, 0  ;;  %v720_v12 = vpack.c.bf16 %v65_v4, %v62_v3  ;;  %v152_v15 = vsub.f32 %v50_v0, %v62_v3  ;;  %p828_p2 = scmp.ne.s32.totalorder %s606_s6, %s827_s7  ;;  %p833_p4 = scmp.lt.s32.totalorder %s827_s7, %s827_s7 }
  0x2a   :  { %v905_v13 = vand.u32 4294901760, %v56_v10  ;;  %v907_v14 = vand.u32 4294901760, %v59_v11  ;;  %v724_v16 = vpack.c.bf16 %v71_v9, %v68_v6  ;;  %v159_v17 = vsub.f32 %v51_v1, %v65_v4 }
  0x2b   :  { %v166_v18 = vsub.f32 %v52_v2, %v68_v6  ;;  %v173_v19 = vsub.f32 %v53_v5, %v71_v9  ;;  %721 = vmatprep.subr.bf16.mxu1 %v720_v12  ;;  %745 = vmatprep.subr.bf16.mxu0 %v720_v12  ;;  %v153_v22 = vand.u32 4294901760, %v152_v15  ;;  %p834_p5 = por %p833_p4, %p832_p3 }
  0x2c   :  { %v131_v20 = vsub.f32 %v56_v10, %v905_v13  ;;  %v141_v21 = vsub.f32 %v59_v11, %v907_v14  ;;  %723 = vmatpush3.bf16.msra.mxu1 %v720_v12  ;;  %747 = vmatpush3.bf16.msra.mxu0 %v720_v12  ;;  %v160_v23 = vand.u32 4294901760, %v159_v17  ;;  %v736_v44 = vpack.c.bf16 %v159_v17, %v152_v15 }
  0x2d   :  { %v167_v24 = vand.u32 4294901760, %v166_v18  ;;  %v174_v25 = vand.u32 4294901760, %v173_v19  ;;  %725 = vmatprep.subr.bf16.mxu1 %v724_v16  ;;  %749 = vmatprep.subr.bf16.mxu0 %v724_v16  ;;  %v154_v28 = vsub.f32 %v152_v15, %v153_v22  ;;  %v740_v45 = vpack.c.bf16 %v173_v19, %v166_v18  ;;  %p835_p6 = pnand %p834_p5, %p828_p2 }
  0x2e   :  { %v132_v26 = vand.u32 4294901760, %v131_v20  ;;  %v142_v27 = vand.u32 4294901760, %v141_v21  ;;  %v161_v29 = vsub.f32 %v159_v17, %v160_v23  ;;  %v752_v30 = vpack.c.bf16 %v160_v23, %v153_v22 }
  0x2f   :  { %v168_v31 = vsub.f32 %v166_v18, %v167_v24  ;;  %v175_v32 = vsub.f32 %v173_v19, %v174_v25  ;;  %v155_v35 = vand.u32 4294901760, %v154_v28  ;;  %v756_v43 = vpack.c.bf16 %v174_v25, %v167_v24 }
  0x30   :  { %v133_v33 = vsub.f32 %v131_v20, %v132_v26  ;;  %695 = vmatprep.mubr.f32.mxu0 %v132_v26  ;;  %v143_v34 = vsub.f32 %v141_v21, %v142_v27  ;;  %727 = vmatpush3.bf16.msra.mxu1 %v724_v16  ;;  %v162_v36 = vand.u32 4294901760, %v161_v29 }
  0x31   :  { %751 = vmatpush3.bf16.msra.mxu0 %v724_v16  ;;  %v169_v37 = vand.u32 4294901760, %v168_v31  ;;  %v176_v38 = vand.u32 4294901760, %v175_v32 }
  0x32   :  { %v134_v39 = vand.u32 4294901760, %v133_v33  ;;  %v144_v40 = vand.u32 4294901760, %v143_v34  ;;  %753 = vmatprep.subr.bf16.mxu0 %v752_v30  ;;  %v728_v41 = vpack.c.bf16 %v162_v36, %v155_v35 }
  0x33   :  { %v732_v42 = vpack.c.bf16 %v176_v38, %v169_v37 }
  0x34   :  { %662 = vmatprep.mubr.f32.mxu1 %v134_v39  ;;  %696 = vmatmul.mubr.f32.vlgmr.msra.gmra.mrb[0].mxu0 %v142_v27 }
  0x35   :  { %663 = vmatmul.mubr.f32.vlgmr.msra.gmra.mrb[0].mxu1 %v144_v40  ;;  %729 = vmatprep.subr.bf16.mxu1 %v728_v41 }
  0x36   :  { %731 = vmatpush3.bf16.msra.mxu1 %v728_v41  ;;  %755 = vmatpush3.bf16.msra.mxu0 %v752_v30 }
  0x37   :  { %733 = vmatprep.subr.bf16.mxu1 %v732_v42  ;;  %757 = vmatprep.subr.bf16.mxu0 %v756_v43 }
  0x38   :  { %673 = vmatprep.mubr.f32.mxu1 %v905_v13  ;;  %706 = vmatprep.mubr.f32.mxu0 %v905_v13 }
  0x3a   :  { %735 = vmatpush3.bf16.msra.mxu1 %v732_v42  ;;  %759 = vmatpush3.bf16.msra.mxu0 %v756_v43 }
  0x3b   :  { %737 = vmatprep.subr.bf16.mxu1 %v736_v44  ;;  %761 = vmatprep.subr.bf16.mxu0 %v720_v12 }
  0x3d   :  { %674 = vmatmul.mubr.f32.vlgmr.msra.gmra.mrb[0].mxu1 %v907_v14  ;;  %707 = vmatmul.mubr.f32.vlgmr.msra.gmra.mrb[0].mxu0 %v907_v14 }
  0x3e   :  { %739 = vmatpush3.bf16.msra.mxu1 %v736_v44  ;;  %763 = vmatpush3.bf16.msra.mxu0 %v720_v12 }
  0x3f   :  { %741 = vmatprep.subr.bf16.mxu1 %v740_v45  ;;  %765 = vmatprep.subr.bf16.mxu0 %v724_v16 }
  0x40   :  { %684 = vmatprep.mubr.f32.mxu1 %v131_v20  ;;  %717 = vmatprep.mubr.f32.mxu0 %v905_v13 }
  0x42   :  { %743 = vmatpush3.bf16.msra.mxu1 %v740_v45  ;;  %767 = vmatpush3.bf16.msra.mxu0 %v724_v16 }
  0x45   :  { %685 = vmatmul.mubr.f32.vlgmr.msra.gmra.mrb[0].mxu1 %v141_v21  ;;  %718 = vmatmul.mubr.f32.vlgmr.msra.gmra.mrb[0].mxu0 %v907_v14 }
 0x118   :  { %v686_v46 = vpop.f32.mrb[0].mxu1  ;;  %v719_v47 = vpop.f32.mrb[0].mxu0 }
 0x119   :  { %v768_v48 = vadd.f32 %v719_v47, %v686_v46  ;;  %v323_v49 = vpop.f32.mrb[1].mxu1  ;;  %v579_v50 = vpop.f32.mrb[1].mxu0 }
 0x11a   :  { %v769_v51 = vadd.f32 %v579_v50, %v323_v49 }
 0x11b   :  { %599 = vst [vmem:[#allocation8 + $0x8] sm:$0xff] %v768_v48 }
 0x11c   :  { %598 = vst [vmem:[#allocation8] sm:$0xff] %v769_v51 }
 0x11d   :  { %838 = shalt.err (!%p835_p6)
}
 0x11e   :  { %s839_s10 = scalar_lea.hbm %s934_s2, 256 }
 0x11f   :  { %p840_p7 = scmp.ne.s32.totalorder %s934_s2, %s839_s10  ;;  %p843_p8 = scmp.lt.u32.totalorder %s839_s10, %s934_s2 }
 0x121   :  { %p845_p9 = pnand %p843_p8, %p840_p7 }
 0x123   :  { %848 = shalt.err (!%p845_p9)
}
 0x124   :  { %611 = dma.vmem_to_hbm [thread:$0]  %s606_s6, 256, %s934_s2, [#allocation5], %s856_s19, %s856_s19, %s857_s20  }
 0x125   :  { %853 = dma.done.wait [#allocation5], 256  }
 0x126   :  { %854 = vsyncadd [#allocation5], 4294967040 }
 0x127   :  { %615 = vsyncpa [#allocation4], 1 }
 0x128   :  { %616 = vsyncpa [#allocation7], 1 }
 0x129   :  { %617 = vsyncpa [#allocation5], 1 }

</bundles_post_ra>
